<compile_context>
chip_gen: v5e
topology: v5e:2x2
jax: 0.10.0
libtpu: 0.0.40
codegen_flags: <defaults>
</compile_context>

<pallas_src>
import math

import jax
import jax.numpy as jnp
from jax.experimental import pallas as pl
from jax.experimental.pallas import tpu as pltpu


def _round_up(n, m):
    return ((n + m - 1) // m) * m


def _dynamic_linear_kernel(attn_ref, x_ref, w_ref, b_ref, o_ref):
    """Computes one (tile_b, tile_n) output tile.

    attn_ref: (tile_b, K)         float32
    x_ref:    (tile_b, in_f)      input dtype
    w_ref:    (K, in_f, tile_n)   compute dtype (contraction-major per expert)
    b_ref:    (K, tile_n)         float32
    o_ref:    (tile_b, tile_n)    output dtype
    """
    attn = attn_ref[...].astype(jnp.float32)               # (tb, K)
    xf = x_ref[...].astype(jnp.float32)                    # (tb, in_f)
    num_experts = attn.shape[1]                            # static

    # Mixed bias, hoisted out of the expert loop: one tiny MXU matmul.
    acc = jax.lax.dot_general(
        attn, b_ref[...],
        dimension_numbers=(((1,), (0,)), ((), ())),
        preferred_element_type=jnp.float32)                # (tb, tn) f32

    # Statically-unrolled expert reduction: fold attn[:, k] into x on the VPU
    # (static lane slice + broadcast; no dynamic slicing), then one full-depth
    # matmul per expert on the MXU, accumulating in f32 registers (no scratch).
    for k in range(num_experts):
        xk = (attn[:, k:k + 1] * xf).astype(w_ref.dtype)   # (tb, in_f)
        acc += jax.lax.dot_general(
            xk, w_ref[k],                                  # (in_f, tn)
            dimension_numbers=(((1,), (0,)), ((), ())),
            preferred_element_type=jnp.float32)

    o_ref[...] = acc.astype(o_ref.dtype)


def dynamic_linear(x, softmax_attention, weight, bias=None, *, compute_dtype=None):
    """Pallas TPU equivalent of DynamicLinear.forward(x, softmax_attention).

    compute_dtype: optionally cast the bandwidth-dominant weight (and the matmul
    operands) to e.g. jnp.bfloat16; accumulation stays float32.
    """
    B, in_f = x.shape
    K, out_f, in_f_w = weight.shape
    assert in_f_w == in_f, (weight.shape, x.shape)
    assert softmax_attention.shape == (B, K)

    if bias is None:
        bias = jnp.zeros((K, out_f), jnp.float32)

    # Wrapper-side layout plumbing: contraction-major weight so each expert slab
    # feeds the MXU untransposed; pad the output dim lane-dense.
    w = jnp.transpose(weight, (0, 2, 1))                   # (K, in_f, out_f)
    if compute_dtype is not None:
        w = w.astype(compute_dtype)

    out_f_p = _round_up(out_f, 128)
    tile_n = min(out_f_p, 256)            # 256-wide lane-dense tiles (128 if out_f small)
    out_f_p = _round_up(out_f_p, tile_n)

    B_p = _round_up(B, 8)
    tile_b = min(B_p, 128)
    B_p = _round_up(B_p, tile_b)

    if out_f_p != out_f:
        w = jnp.pad(w, ((0, 0), (0, 0), (0, out_f_p - out_f)))
        bias = jnp.pad(bias, ((0, 0), (0, out_f_p - out_f)))
    if B_p != B:
        x = jnp.pad(x, ((0, B_p - B), (0, 0)))
        softmax_attention = jnp.pad(softmax_attention, ((0, B_p - B), (0, 0)))

    attn = softmax_attention.astype(jnp.float32)
    bias = bias.astype(jnp.float32)                        # bias is tiny; keep f32

    grid = (B_p // tile_b, out_f_p // tile_n)

    cost = pl.CostEstimate(
        flops=2 * B_p * K * in_f * out_f_p + 2 * B_p * K * out_f_p,
        transcendentals=0,
        bytes_accessed=(attn.size * 4
                        + x.size * x.dtype.itemsize
                        + w.size * w.dtype.itemsize
                        + bias.size * 4
                        + B_p * out_f_p * x.dtype.itemsize),
    )

    out_p = pl.pallas_call(
        _dynamic_linear_kernel,
        out_shape=jax.ShapeDtypeStruct((B_p, out_f_p), x.dtype),
        grid_spec=pltpu.PrefetchScalarGridSpec(
            num_scalar_prefetch=0,
            grid=grid,
            in_specs=[
                pl.BlockSpec((tile_b, K), lambda i, j: (i, 0)),           # attn
                pl.BlockSpec((tile_b, in_f), lambda i, j: (i, 0)),        # x
                pl.BlockSpec((K, in_f, tile_n), lambda i, j: (0, 0, j)),  # weight (one DMA)
                pl.BlockSpec((K, tile_n), lambda i, j: (0, j)),           # bias
            ],
            out_specs=pl.BlockSpec((tile_b, tile_n), lambda i, j: (i, j)),
        ),
        compiler_params=pltpu.CompilerParams(
            dimension_semantics=("parallel", "parallel")),
        cost_estimate=cost,
    )(attn, x, w, bias)

    return out_p[:B, :out_f]


def init_params(key, in_features, out_features, K):
    """Deterministic kaiming-uniform-style init matching the module's __init__ shapes."""
    kw, kb = jax.random.split(key)
    w_bound = 1.0 / math.sqrt(in_features)
    weight = jax.random.uniform(
        kw, (K, out_features, in_features), jnp.float32, -w_bound, w_bound)
    b_bound = 1.0 / math.sqrt(in_features)
    bias = jax.random.uniform(kb, (K, out_features), jnp.float32, -b_bound, b_bound)
    return weight, bias


if __name__ == "__main__":
    # Small shapes consistent with the module: batch=8, in_features=32, out_features=16, K=4.
    B, IN_F, OUT_F, K = 8, 32, 16, 4

    key = jax.random.PRNGKey(0)
    k_x, k_attn, k_params = jax.random.split(key, 3)

    x = jax.random.normal(k_x, (B, IN_F), jnp.float32)
    attn_logits = jax.random.normal(k_attn, (B, K), jnp.float32)
    softmax_attention = jax.nn.softmax(attn_logits, axis=-1)
    weight, bias = init_params(k_params, IN_F, OUT_F, K)

    out = dynamic_linear(x, softmax_attention, weight, bias)
    out = jax.block_until_ready(out)

    # Pure-JAX reference of the grouped-conv1d dynamic-linear semantics.
    ref = (jnp.einsum("bk,koi,bi->bo", softmax_attention, weight, x)
           + softmax_attention @ bias)

    assert out.shape == (B, OUT_F)
    assert jnp.allclose(out, ref, rtol=1e-5, atol=1e-5), (
        f"max abs err {jnp.max(jnp.abs(out - ref))}")

    print("KERNEL_OK")
</pallas_src>

<mosaic_0001>
module attributes {stable_mosaic.version = 11 : i64} {
  func.func @_dynamic_linear_kernel(%arg0: i32, %arg1: i32, %arg2: memref<8x4xf32, #tpu.memory_space<vmem>>, %arg3: memref<8x32xf32, #tpu.memory_space<vmem>>, %arg4: memref<4x32x128xf32, #tpu.memory_space<vmem>>, %arg5: memref<4x128xf32, #tpu.memory_space<vmem>>, %arg6: memref<8x128xf32, #tpu.memory_space<vmem>>) attributes {dimension_semantics = [#tpu.dimension_semantics<parallel>, #tpu.dimension_semantics<parallel>], iteration_bounds = array<i64: 1, 1>, scalar_prefetch = 0 : i64, scratch_operands = 0 : i64, tpu.core_type = #tpu.core_type<tc>, window_params = [{transform_indices = @transform_0, window_bounds = array<i64: 8, 4>}, {transform_indices = @transform_1, window_bounds = array<i64: 8, 32>}, {transform_indices = @transform_2, window_bounds = array<i64: 4, 32, 128>}, {transform_indices = @transform_3, window_bounds = array<i64: 4, 128>}, {transform_indices = @transform_4, window_bounds = array<i64: 8, 128>}]} {
    %c0 = arith.constant 0 : index
    %c0_0 = arith.constant 0 : index
    %0 = vector.load %arg2[%c0, %c0_0] : memref<8x4xf32, #tpu.memory_space<vmem>>, vector<8x4xf32>
    %c0_1 = arith.constant 0 : index
    %c0_2 = arith.constant 0 : index
    %1 = vector.load %arg3[%c0_1, %c0_2] : memref<8x32xf32, #tpu.memory_space<vmem>>, vector<8x32xf32>
    %c0_3 = arith.constant 0 : index
    %c0_4 = arith.constant 0 : index
    %2 = vector.load %arg5[%c0_3, %c0_4] : memref<4x128xf32, #tpu.memory_space<vmem>>, vector<4x128xf32>
    %cst = arith.constant dense<0.000000e+00> : vector<8x128xf32>
    %3 = tpu.matmul %0, %2, %cst {dimension_numbers = #tpu.dot_dimension_numbers<[1], [0], [0], [1], [0, 0, 1, 1], [], []>} : vector<8x4xf32>, vector<4x128xf32>, vector<8x128xf32> -> vector<8x128xf32>
    %4 = vector.extract_strided_slice %0 {offsets = [0, 0], sizes = [8, 1], strides = [1, 1]} : vector<8x4xf32> to vector<8x1xf32>
    %5 = vector.broadcast %4 : vector<8x1xf32> to vector<8x32xf32>
    %6 = arith.mulf %5, %1 : vector<8x32xf32>
    %c0_5 = arith.constant 0 : index
    %c0_6 = arith.constant 0 : index
    %c0_7 = arith.constant 0 : index
    %7 = vector.load %arg4[%c0_5, %c0_6, %c0_7] : memref<4x32x128xf32, #tpu.memory_space<vmem>>, vector<1x32x128xf32>
    %8 = vector.shape_cast %7 : vector<1x32x128xf32> to vector<32x128xf32>
    %cst_8 = arith.constant dense<0.000000e+00> : vector<8x128xf32>
    %9 = tpu.matmul %6, %8, %cst_8 {dimension_numbers = #tpu.dot_dimension_numbers<[1], [0], [0], [1], [0, 0, 1, 1], [], []>} : vector<8x32xf32>, vector<32x128xf32>, vector<8x128xf32> -> vector<8x128xf32>
    %10 = arith.addf %3, %9 : vector<8x128xf32>
    %11 = vector.extract_strided_slice %0 {offsets = [0, 1], sizes = [8, 1], strides = [1, 1]} : vector<8x4xf32> to vector<8x1xf32>
    %12 = vector.broadcast %11 : vector<8x1xf32> to vector<8x32xf32>
    %13 = arith.mulf %12, %1 : vector<8x32xf32>
    %c1 = arith.constant 1 : index
    %c0_9 = arith.constant 0 : index
    %c0_10 = arith.constant 0 : index
    %14 = vector.load %arg4[%c1, %c0_9, %c0_10] : memref<4x32x128xf32, #tpu.memory_space<vmem>>, vector<1x32x128xf32>
    %15 = vector.shape_cast %14 : vector<1x32x128xf32> to vector<32x128xf32>
    %cst_11 = arith.constant dense<0.000000e+00> : vector<8x128xf32>
    %16 = tpu.matmul %13, %15, %cst_11 {dimension_numbers = #tpu.dot_dimension_numbers<[1], [0], [0], [1], [0, 0, 1, 1], [], []>} : vector<8x32xf32>, vector<32x128xf32>, vector<8x128xf32> -> vector<8x128xf32>
    %17 = arith.addf %10, %16 : vector<8x128xf32>
    %18 = vector.extract_strided_slice %0 {offsets = [0, 2], sizes = [8, 1], strides = [1, 1]} : vector<8x4xf32> to vector<8x1xf32>
    %19 = vector.broadcast %18 : vector<8x1xf32> to vector<8x32xf32>
    %20 = arith.mulf %19, %1 : vector<8x32xf32>
    %c2 = arith.constant 2 : index
    %c0_12 = arith.constant 0 : index
    %c0_13 = arith.constant 0 : index
    %21 = vector.load %arg4[%c2, %c0_12, %c0_13] : memref<4x32x128xf32, #tpu.memory_space<vmem>>, vector<1x32x128xf32>
    %22 = vector.shape_cast %21 : vector<1x32x128xf32> to vector<32x128xf32>
    %cst_14 = arith.constant dense<0.000000e+00> : vector<8x128xf32>
    %23 = tpu.matmul %20, %22, %cst_14 {dimension_numbers = #tpu.dot_dimension_numbers<[1], [0], [0], [1], [0, 0, 1, 1], [], []>} : vector<8x32xf32>, vector<32x128xf32>, vector<8x128xf32> -> vector<8x128xf32>
    %24 = arith.addf %17, %23 : vector<8x128xf32>
    %25 = vector.extract_strided_slice %0 {offsets = [0, 3], sizes = [8, 1], strides = [1, 1]} : vector<8x4xf32> to vector<8x1xf32>
    %26 = vector.broadcast %25 : vector<8x1xf32> to vector<8x32xf32>
    %27 = arith.mulf %26, %1 : vector<8x32xf32>
    %c3 = arith.constant 3 : index
    %c0_15 = arith.constant 0 : index
    %c0_16 = arith.constant 0 : index
    %28 = vector.load %arg4[%c3, %c0_15, %c0_16] : memref<4x32x128xf32, #tpu.memory_space<vmem>>, vector<1x32x128xf32>
    %29 = vector.shape_cast %28 : vector<1x32x128xf32> to vector<32x128xf32>
    %cst_17 = arith.constant dense<0.000000e+00> : vector<8x128xf32>
    %30 = tpu.matmul %27, %29, %cst_17 {dimension_numbers = #tpu.dot_dimension_numbers<[1], [0], [0], [1], [0, 0, 1, 1], [], []>} : vector<8x32xf32>, vector<32x128xf32>, vector<8x128xf32> -> vector<8x128xf32>
    %31 = arith.addf %24, %30 : vector<8x128xf32>
    %c0_18 = arith.constant 0 : index
    %c0_19 = arith.constant 0 : index
    %32 = vector.load %arg6[%c0_18, %c0_19] : memref<8x128xf32, #tpu.memory_space<vmem>>, vector<8x128xf32>
    tpu.vector_store %arg6[%c0_18, %c0_19], %31 {strides = array<i32>} : memref<8x128xf32, #tpu.memory_space<vmem>>, vector<8x128xf32>,
    return
  }
  func.func @transform_0(%arg0: i32, %arg1: i32) -> (i32, i32) {
    %c0_i32 = arith.constant 0 : i32
    %c0_i32_0 = arith.constant 0 : i32
    return %arg0, %c0_i32 : i32, i32
  }
  func.func @transform_1(%arg0: i32, %arg1: i32) -> (i32, i32) {
    %c0_i32 = arith.constant 0 : i32
    %c0_i32_0 = arith.constant 0 : i32
    return %arg0, %c0_i32 : i32, i32
  }
  func.func @transform_2(%arg0: i32, %arg1: i32) -> (i32, i32, i32) {
    %c0_i32 = arith.constant 0 : i32
    %c0_i32_0 = arith.constant 0 : i32
    %c0_i32_1 = arith.constant 0 : i32
    return %c0_i32, %c0_i32_0, %arg1 : i32, i32, i32
  }
  func.func @transform_3(%arg0: i32, %arg1: i32) -> (i32, i32) {
    %c0_i32 = arith.constant 0 : i32
    %c0_i32_0 = arith.constant 0 : i32
    return %c0_i32, %arg1 : i32, i32
  }
  func.func @transform_4(%arg0: i32, %arg1: i32) -> (i32, i32) {
    %c0_i32 = arith.constant 0 : i32
    return %arg0, %arg1 : i32, i32
  }
}

</mosaic_0001>

<bundles_post_ra>
// kernel: tpu_custom_call.1
= control target key start
LH: loop header
LB: loop body
LE: loop exit
PB: predicated region body
PF: predicated region fallthrough
CT: control target
= control target key end

     0   :  { %9 = vsyncpa [#allocation3], 0  ;;  %s337_s0 = inlined_call_operand.vmem [shape: f32[8,4], index: 0, kind: input, shape index: {}]   ;;  %s338_s1 = inlined_call_operand.vmem [shape: f32[8,32], index: 1, kind: input, shape index: {}]   ;;  %s339_s2 = inlined_call_operand.hbm [shape: f32[4,32,128], index: 2, kind: input, shape index: {}]   ;;  %s340_s3 = inlined_call_operand.vmem [shape: f32[4,128], index: 3, kind: input, shape index: {}]   ;;  %s341_s4 = inlined_call_operand.hbm [shape: f32[8,128], index: 4, kind: output, shape index: {}]  }
   0x1   :  { %10 = vsyncpa [#allocation4], 0  ;;  %s19_s17 = sshll.u32 %s339_s2, 4  ;;  %s289_s18 = smov [#allocation2]   ;;  %s20_s17 = int_to_ptr.hbm [resolvable:$true] %s19_s17 }
   0x2   :  { %s21_s19 = sshll.u32 %s289_s18, 4  ;;  %s290_s20 = smov 128   ;;  %s22_s19 = int_to_ptr.vmem [resolvable:$true] %s21_s19 }
   0x3   :  { %s291_s21 = smov 8  }
   0x4   :  { %27 = dma.hbm_to_vmem [thread:$0]  %s20_s17, 2048, %s22_s19, [#allocation3], %s290_s20, %s290_s20, %s291_s21  }
   0x5   :  { %285 = dma.done.wait [#allocation3], 2048  }
   0x6   :  { %286 = vsyncadd [#allocation3], 4294965248  ;;  %v292_v0 = vmov 1   ;;  %v293_v1 = vmov 0   ;;  %v34_v2 = vld [vmem:[%s337_s0] sm:$0xff]  ;;  %v107_v3 = vld [vmem:[#allocation2 + $0x38] sm:$0xff] }
   0x7   :  { %232 = vset.pattern.permute.xlu0 %v292_v0  ;;  %234 = vset.pattern.permute.xlu1 %v293_v1  ;;  %v106_v4 = vld [vmem:[#allocation2 + $0x30] sm:$0xff]  ;;  %v46_v5 = vld [vmem:[#allocation2 + $0x18] sm:$0xff]  ;;  %v105_v6 = vld [vmem:[#allocation2 + $0x28] sm:$0xff]  ;;  %v294_v7 = vmov 2   ;;  %v295_v8 = vmov 3   ;;  %vm74_vm0 = vcmask 1043456  }
   0x8   :  { %99 = vperm.xlu0 %232, %v34_v2   ;;  %39 = vperm.xlu1 %234, %v34_v2   ;;  %v45_v9 = vld [vmem:[#allocation2 + $0x10] sm:$0xff]  ;;  %v104_v10 = vld [vmem:[#allocation2 + $0x20] sm:$0xff]  ;;  %v44_v11 = vld [vmem:[#allocation2 + $0x8] sm:$0xff]  ;;  %vm71_vm1 = vcmask 31744   ;;  %vm47_vm2 = vcmask 261120   ;;  %s208_s28 = sshll.u32 %s341_s4, 4  ;;  %s209_s28 = int_to_ptr.hbm [resolvable:$true] %s208_s28 }
   0x9   :  { %123 = vmatpush.msra.mxu2 %v107_v3  ;;  %63 = vmatpush.msra.mxu0 %v46_v5  ;;  %v141_v12 = vld [vmem:[#allocation2 + $0x58] sm:$0xff]  ;;  %v43_v13 = vld [vmem:[#allocation2] sm:$0xff]  ;;  %v140_v15 = vld [vmem:[#allocation2 + $0x50] sm:$0xff] }
   0xa   :  { %157 = vmatpush.msra.mxu3 %v141_v12  ;;  %v36_v14 = vld [vmem:[%s340_s3] sm:$0xf]  ;;  %v139_v16 = vld [vmem:[#allocation2 + $0x48] sm:$0xff]  ;;  %v175_v18 = vld [vmem:[#allocation2 + $0x78] sm:$0xff] }
   0xb   :  { %124 = vmatpush.msra.mxu2 %v106_v4  ;;  %64 = vmatpush.msra.mxu0 %v45_v9  ;;  %v138_v17 = vld [vmem:[#allocation2 + $0x40] sm:$0xff]  ;;  %v174_v19 = vld [vmem:[#allocation2 + $0x70] sm:$0xff]  ;;  %v173_v20 = vld [vmem:[#allocation2 + $0x68] sm:$0xff] }
   0xc   :  { %219 = vmatpush.msk.msra.mxu1 %vm74_vm0, %v36_v14  ;;  %158 = vmatpush.msra.mxu3 %v140_v15  ;;  %v172_v21 = vld [vmem:[#allocation2 + $0x60] sm:$0xff] }
   0xd   :  { %125 = vmatpush.msra.mxu2 %v105_v6  ;;  %65 = vmatpush.msra.mxu0 %v44_v11  ;;  %v35_v22 = vld [vmem:[%s338_s1] sm:$0xff]  ;;  %s296_s1 = smov [#allocation5]  }
   0xe   :  { %220 = vmatmul.msk.f32.vlgmr.msra.gmra.mxu1 %vm71_vm1, %v34_v2  ;;  %159 = vmatpush.msra.mxu3 %v139_v16  ;;  %s206_s3 = sshll.u32 %s296_s1, 4  ;;  %s207_s3 = int_to_ptr.vmem [resolvable:$true] %s206_s3 }
   0xf   :  { %126 = vmatpush.msra.mxu2 %v104_v10  ;;  %66 = vmatpush.msra.mxu0 %v43_v13 }
  0x10   :  { %233 = vset.pattern.permute.xlu0 %v294_v7  ;;  %235 = vset.pattern.permute.xlu1 %v295_v8 }
  0x11   :  { %133 = vperm.xlu0 %233, %v34_v2   ;;  %167 = vperm.xlu1 %235, %v34_v2  }
  0x12   :  { %160 = vmatpush.msra.mxu3 %v138_v17  ;;  %191 = vmatpush.msrb.mxu1 %v175_v18 }
  0x14   :  { %192 = vmatpush.msrb.mxu1 %v174_v19 }
  0x16   :  { %193 = vmatpush.msrb.mxu1 %v173_v20 }
  0x18   :  { %194 = vmatpush.msrb.mxu1 %v172_v21 }
  0x19   :  { %236 = vset.pattern.permute.xlu0 %v295_v8 }
  0x7a   :  { %v100_v23 = vpop.permute.xlu0 %99  ;;  %v40_v24 = vpop.permute.xlu1 %39 }
  0x7b   :  { %v102_v25 = vmul.f32 %v100_v23, %v35_v22  ;;  %v42_v26 = vmul.f32 %v40_v24, %v35_v22 }
  0x7d   :  { %221 = vmatmul.msk.f32.vlgmr.msra.gmra.mxu2 %vm47_vm2, %v102_v25  ;;  %218 = vmatmul.msk.f32.vlgmr.msra.gmra.mxu0 %vm47_vm2, %v42_v26 }
  0x83   :  { %v134_v27 = vpop.permute.xlu0 %133  ;;  %v168_v28 = vpop.permute.xlu1 %167 }
  0x84   :  { %v136_v29 = vmul.f32 %v134_v27, %v35_v22  ;;  %v170_v30 = vmul.f32 %v168_v28, %v35_v22 }
  0x86   :  { %222 = vmatmul.msk.f32.vlgmr.msra.gmra.mxu3 %vm47_vm2, %v136_v29  ;;  %223 = vmatmul.msk.f32.vlgmr.msrb.gmra.mxu1 %vm47_vm2, %v170_v30 }
  0x8b   :  { %v95_v32 = vpop.f32.mrf.mxu1 }
  0xfa   :  { %v68_v31 = vpop.f32.mrf.mxu0 }
  0xfb   :  { %v96_v33 = vadd.f32 %v95_v32, %v68_v31 }
 0x100   :  { %v128_v34 = vpop.f32.mrf.mxu2 }
 0x101   :  { %v131_v35 = vadd.f32 %v128_v34, %v96_v33 }
 0x103   :  { %v196_v37 = vpop.f32.mrf.mxu1 }
 0x109   :  { %v162_v36 = vpop.f32.mrf.mxu3 }
 0x10a   :  { %v165_v38 = vadd.f32 %v162_v36, %v131_v35 }
 0x10c   :  { %v199_v39 = vadd.f32 %v196_v37, %v165_v38 }
 0x10e   :  { %200 = vst [vmem:[#allocation5] sm:$0xff] %v199_v39 }
 0x10f   :  { %211 = dma.vmem_to_hbm [thread:$0]  %s207_s3, 128, %s209_s28, [#allocation4]  }
 0x110   :  { %287 = dma.done.wait [#allocation4], 128  }
 0x111   :  { %288 = vsyncadd [#allocation4], 4294967168 }
 0x112   :  { %216 = vsyncpa [#allocation3], 1 }
 0x113   :  { %217 = vsyncpa [#allocation4], 1 }

</bundles_post_ra>
